<compile_context>
chip_gen: v6e
topology: v6e:2x2x1
jax: 0.10.0
libtpu: 0.0.40
codegen_flags: <defaults>
</compile_context>

<pallas_src>
import functools

import jax
import jax.numpy as jnp
from jax.experimental import pallas as pl
from jax.experimental.pallas import tpu as pltpu


def _round_up(n: int, m: int) -> int:
    return ((n + m - 1) // m) * m


def _ae_kernel(x_ref, we_ref, be_ref, wd_ref, bd_ref,
               wf1_ref, wf2_ref, bf_ref,
               r1_ref, r2_ref, e1_ref, ne_ref):
    """One batch tile of the AEBuilder forward (all dims pre-padded lane-dense).

    x_ref       : (TB, Lp)   input series tile           (compute dtype)
    we/be       : (Lp, Dp), (1, Dp)   encoder linear     (W in compute dtype, b in f32)
    wd/bd       : (Dp, Lp), (1, Lp)   decoder linear
    wf1/wf2/bf  : (Dp, Dp) x2, (1, Dp)  fc_layer split into the halves acting
                  on embedding1 / embedding2
    outputs     : recons1 (TB, Lp), recons2 (TB, Lp),
                  embedding1 (TB, Dp), new_embedding (TB, Dp)   (all f32)
    """
    cdt = we_ref.dtype
    x = x_ref[...]
    we = we_ref[...]
    wd = wd_ref[...]
    be = be_ref[...]
    bd = bd_ref[...]
    bf = bf_ref[...]

    # embedding1 = encode(input)
    e1 = jnp.tanh(jnp.dot(x, we, preferred_element_type=jnp.float32) + be)
    # recons1 = decode(embedding1)
    r1 = jnp.dot(e1.astype(cdt), wd, preferred_element_type=jnp.float32) + bd
    # embedding2 = encode(recons1)
    e2 = jnp.tanh(jnp.dot(r1.astype(cdt), we, preferred_element_type=jnp.float32) + be)
    # new_embedding = fc_layer(concat([embedding1, embedding2], dim=1))
    #              == e1 @ Wfc[:D] + e2 @ Wfc[D:] + bfc
    ne = (jnp.dot(e1.astype(cdt), wf1_ref[...], preferred_element_type=jnp.float32)
          + jnp.dot(e2.astype(cdt), wf2_ref[...], preferred_element_type=jnp.float32)
          + bf)
    # recons2 = decode(new_embedding)
    r2 = jnp.dot(ne.astype(cdt), wd, preferred_element_type=jnp.float32) + bd

    r1_ref[...] = r1.astype(r1_ref.dtype)
    r2_ref[...] = r2.astype(r2_ref.dtype)
    e1_ref[...] = e1.astype(e1_ref.dtype)
    ne_ref[...] = ne.astype(ne_ref.dtype)


@functools.partial(jax.jit, static_argnames=("tb_max", "compute_dtype"))
def ae_builder_forward(x, params, *, tb_max=128, compute_dtype=jnp.bfloat16):
    """AEBuilder forward. Returns (recons1, recons2, embedding1, new_embedding)."""
    B, L = x.shape
    D = params["we"].shape[1]
    cdt = compute_dtype

    # Lane-dense padding of the feature dims; batch padded to a multiple of the
    # batch tile (tile = min(tb_max, whole batch), always a multiple of 8).
    Lp = _round_up(L, 128)
    Dp = _round_up(D, 128)
    tb = min(tb_max, _round_up(B, 8))
    Bp = _round_up(B, tb)

    # Zero-pad input and weights (exact: padded rows/cols contribute nothing).
    xp = jnp.zeros((Bp, Lp), cdt).at[:B, :L].set(x.astype(cdt))
    we = jnp.zeros((Lp, Dp), cdt).at[:L, :D].set(params["we"].astype(cdt))
    wd = jnp.zeros((Dp, Lp), cdt).at[:D, :L].set(params["wd"].astype(cdt))
    wf1 = jnp.zeros((Dp, Dp), cdt).at[:D, :D].set(params["wf1"].astype(cdt))
    wf2 = jnp.zeros((Dp, Dp), cdt).at[:D, :D].set(params["wf2"].astype(cdt))
    be = jnp.zeros((1, Dp), jnp.float32).at[:, :D].set(params["be"].astype(jnp.float32))
    bd = jnp.zeros((1, Lp), jnp.float32).at[:, :L].set(params["bd"].astype(jnp.float32))
    bf = jnp.zeros((1, Dp), jnp.float32).at[:, :D].set(params["bf"].astype(jnp.float32))

    ser_spec = pl.BlockSpec((tb, Lp), lambda i: (i, 0))
    emb_spec = pl.BlockSpec((tb, Dp), lambda i: (i, 0))

    def rep(shape):
        # Grid-invariant full-array block with a constant index_map: the
        # pipeline does not re-fetch these between consecutive grid steps.
        return pl.BlockSpec(shape, lambda i: (0,) * len(shape))

    out_shapes = (
        jax.ShapeDtypeStruct((Bp, Lp), jnp.float32),   # recons1
        jax.ShapeDtypeStruct((Bp, Lp), jnp.float32),   # recons2
        jax.ShapeDtypeStruct((Bp, Dp), jnp.float32),   # embedding1
        jax.ShapeDtypeStruct((Bp, Dp), jnp.float32),   # new_embedding
    )

    # Explicit VMEM budget: double-buffered I/O tiles + all replicated weights,
    # with headroom.  Keeps the tile choice honest on v7x (64 MiB physical).
    cb = jnp.dtype(cdt).itemsize
    io_bytes = tb * Lp * cb + 2 * tb * Lp * 4 + 2 * tb * Dp * 4
    w_bytes = (Lp * Dp + Dp * Lp + 2 * Dp * Dp) * cb + (2 * Dp + Lp) * 4
    vmem_limit = min(max(8 * (io_bytes + w_bytes), 16 * 1024 * 1024),
                     48 * 1024 * 1024)

    r1p, r2p, e1p, nep = pl.pallas_call(
        _ae_kernel,
        out_shape=out_shapes,
        grid_spec=pltpu.PrefetchScalarGridSpec(
            num_scalar_prefetch=0,
            grid=(Bp // tb,),
            in_specs=[
                ser_spec,
                rep((Lp, Dp)), rep((1, Dp)),
                rep((Dp, Lp)), rep((1, Lp)),
                rep((Dp, Dp)), rep((Dp, Dp)), rep((1, Dp)),
            ],
            out_specs=[ser_spec, ser_spec, emb_spec, emb_spec],
        ),
        compiler_params=pltpu.CompilerParams(
            dimension_semantics=("parallel",),
            vmem_limit_bytes=vmem_limit),
    )(xp, we, be, wd, bd, wf1, wf2, bf)

    return (r1p[:B, :L], r2p[:B, :L], e1p[:B, :D], nep[:B, :D])


def ae_builder_reference(x, params, compute_dtype=jnp.float32):
    """Pure-JAX reference; mirrors the kernel's low-precision matmul inputs."""
    cdt = compute_dtype

    def mm(a, w):
        return jnp.dot(a.astype(cdt), w.astype(cdt),
                       preferred_element_type=jnp.float32)

    def encode(v):
        return jnp.tanh(mm(v, params["we"]) + params["be"])

    def decode(e):
        return mm(e, params["wd"]) + params["bd"]

    e1 = encode(x)
    r1 = decode(e1)
    e2 = encode(r1)
    cat = jnp.concatenate([e1, e2], axis=1)
    wf = jnp.concatenate([params["wf1"], params["wf2"]], axis=0)
    ne = mm(cat, wf) + params["bf"]
    r2 = decode(ne)
    return r1, r2, e1, ne


def init_params(key, dim_series, dim_embedding):
    ks = jax.random.split(key, 7)
    se = 1.0 / jnp.sqrt(dim_series)
    sd = 1.0 / jnp.sqrt(dim_embedding)
    sf = 1.0 / jnp.sqrt(2 * dim_embedding)
    u = jax.random.uniform
    return {
        # encoder Linear(dim_series -> dim_embedding), stored (in, out)
        "we": u(ks[0], (dim_series, dim_embedding), jnp.float32, -se, se),
        "be": u(ks[1], (1, dim_embedding), jnp.float32, -se, se),
        # decoder Linear(dim_embedding -> dim_series), stored (in, out)
        "wd": u(ks[2], (dim_embedding, dim_series), jnp.float32, -sd, sd),
        "bd": u(ks[3], (1, dim_series), jnp.float32, -sd, sd),
        # fc_layer Linear(2*dim_embedding -> dim_embedding), split into halves
        "wf1": u(ks[4], (dim_embedding, dim_embedding), jnp.float32, -sf, sf),
        "wf2": u(ks[5], (dim_embedding, dim_embedding), jnp.float32, -sf, sf),
        "bf": u(ks[6], (1, dim_embedding), jnp.float32, -sf, sf),
    }


if __name__ == "__main__":
    B = 256   # batch -> 2 grid steps at tb=128, so v7x can use both TensorCores
    L = 64    # dim_series (input series length)
    D = 16    # dim_embedding

    key = jax.random.PRNGKey(0)
    k_x, k_p = jax.random.split(key)
    x = jax.random.normal(k_x, (B, L), jnp.float32)
    params = init_params(k_p, L, D)

    outs = jax.block_until_ready(ae_builder_forward(x, params))

    # Reference mirrors the kernel's bf16-matmul / f32-accumulate arithmetic.
    refs = ae_builder_reference(x, params, compute_dtype=jnp.bfloat16)
    names = ("recons1", "recons2", "embedding1", "new_embedding")
    for name, o, r in zip(names, outs, refs):
        assert o.shape == r.shape and o.dtype == r.dtype, name
        assert jnp.allclose(o, r, atol=1e-2, rtol=1e-2), f"mismatch vs reference: {name}"

    print("KERNEL_OK")
</pallas_src>

<mosaic_0001>
module attributes {stable_mosaic.version = 11 : i64} {
  func.func @_ae_kernel(%arg0: i32, %arg1: memref<128x128xbf16, #tpu.memory_space<vmem>>, %arg2: memref<128x128xbf16, #tpu.memory_space<vmem>>, %arg3: memref<1x128xf32, #tpu.memory_space<vmem>>, %arg4: memref<128x128xbf16, #tpu.memory_space<vmem>>, %arg5: memref<1x128xf32, #tpu.memory_space<vmem>>, %arg6: memref<128x128xbf16, #tpu.memory_space<vmem>>, %arg7: memref<128x128xbf16, #tpu.memory_space<vmem>>, %arg8: memref<1x128xf32, #tpu.memory_space<vmem>>, %arg9: memref<128x128xf32, #tpu.memory_space<vmem>>, %arg10: memref<128x128xf32, #tpu.memory_space<vmem>>, %arg11: memref<128x128xf32, #tpu.memory_space<vmem>>, %arg12: memref<128x128xf32, #tpu.memory_space<vmem>>) attributes {dimension_semantics = [#tpu.dimension_semantics<parallel>], iteration_bounds = array<i64: 2>, scalar_prefetch = 0 : i64, scratch_operands = 0 : i64, tpu.core_type = #tpu.core_type<tc>, window_params = [{transform_indices = @transform_0, window_bounds = array<i64: 128, 128>}, {pipeline_mode = #tpu.pipeline_mode<synchronous>, transform_indices = @transform_1, window_bounds = array<i64: 128, 128>}, {pipeline_mode = #tpu.pipeline_mode<synchronous>, transform_indices = @transform_2, window_bounds = array<i64: 1, 128>}, {pipeline_mode = #tpu.pipeline_mode<synchronous>, transform_indices = @transform_3, window_bounds = array<i64: 128, 128>}, {pipeline_mode = #tpu.pipeline_mode<synchronous>, transform_indices = @transform_4, window_bounds = array<i64: 1, 128>}, {pipeline_mode = #tpu.pipeline_mode<synchronous>, transform_indices = @transform_5, window_bounds = array<i64: 128, 128>}, {pipeline_mode = #tpu.pipeline_mode<synchronous>, transform_indices = @transform_6, window_bounds = array<i64: 128, 128>}, {pipeline_mode = #tpu.pipeline_mode<synchronous>, transform_indices = @transform_7, window_bounds = array<i64: 1, 128>}, {transform_indices = @transform_8, window_bounds = array<i64: 128, 128>}, {transform_indices = @transform_9, window_bounds = array<i64: 128, 128>}, {transform_indices = @transform_10, window_bounds = array<i64: 128, 128>}, {transform_indices = @transform_11, window_bounds = array<i64: 128, 128>}]} {
    %c0 = arith.constant 0 : index
    %c0_0 = arith.constant 0 : index
    %0 = vector.load %arg1[%c0, %c0_0] : memref<128x128xbf16, #tpu.memory_space<vmem>>, vector<128x128xbf16>
    %c0_1 = arith.constant 0 : index
    %c0_2 = arith.constant 0 : index
    %1 = vector.load %arg2[%c0_1, %c0_2] : memref<128x128xbf16, #tpu.memory_space<vmem>>, vector<128x128xbf16>
    %c0_3 = arith.constant 0 : index
    %c0_4 = arith.constant 0 : index
    %2 = vector.load %arg4[%c0_3, %c0_4] : memref<128x128xbf16, #tpu.memory_space<vmem>>, vector<128x128xbf16>
    %c0_5 = arith.constant 0 : index
    %c0_6 = arith.constant 0 : index
    %3 = vector.load %arg3[%c0_5, %c0_6] : memref<1x128xf32, #tpu.memory_space<vmem>>, vector<1x128xf32>
    %c0_7 = arith.constant 0 : index
    %c0_8 = arith.constant 0 : index
    %4 = vector.load %arg5[%c0_7, %c0_8] : memref<1x128xf32, #tpu.memory_space<vmem>>, vector<1x128xf32>
    %c0_9 = arith.constant 0 : index
    %c0_10 = arith.constant 0 : index
    %5 = vector.load %arg8[%c0_9, %c0_10] : memref<1x128xf32, #tpu.memory_space<vmem>>, vector<1x128xf32>
    %cst = arith.constant dense<0.000000e+00> : vector<128x128xf32>
    %6 = tpu.matmul %0, %1, %cst {dimension_numbers = #tpu.dot_dimension_numbers<[1], [0], [0], [1], [0, 0, 1, 1], [], []>} : vector<128x128xbf16>, vector<128x128xbf16>, vector<128x128xf32> -> vector<128x128xf32>
    %7 = vector.broadcast %3 : vector<1x128xf32> to vector<128x128xf32>
    %8 = arith.addf %6, %7 : vector<128x128xf32>
    %9 = math.tanh %8 : vector<128x128xf32>
    %10 = arith.truncf %9 : vector<128x128xf32> to vector<128x128xbf16>
    %cst_11 = arith.constant dense<0.000000e+00> : vector<128x128xf32>
    %11 = tpu.matmul %10, %2, %cst_11 {dimension_numbers = #tpu.dot_dimension_numbers<[1], [0], [0], [1], [0, 0, 1, 1], [], []>} : vector<128x128xbf16>, vector<128x128xbf16>, vector<128x128xf32> -> vector<128x128xf32>
    %12 = vector.broadcast %4 : vector<1x128xf32> to vector<128x128xf32>
    %13 = arith.addf %11, %12 : vector<128x128xf32>
    %14 = arith.truncf %13 : vector<128x128xf32> to vector<128x128xbf16>
    %cst_12 = arith.constant dense<0.000000e+00> : vector<128x128xf32>
    %15 = tpu.matmul %14, %1, %cst_12 {dimension_numbers = #tpu.dot_dimension_numbers<[1], [0], [0], [1], [0, 0, 1, 1], [], []>} : vector<128x128xbf16>, vector<128x128xbf16>, vector<128x128xf32> -> vector<128x128xf32>
    %16 = vector.broadcast %3 : vector<1x128xf32> to vector<128x128xf32>
    %17 = arith.addf %15, %16 : vector<128x128xf32>
    %18 = math.tanh %17 : vector<128x128xf32>
    %19 = arith.truncf %9 : vector<128x128xf32> to vector<128x128xbf16>
    %c0_13 = arith.constant 0 : index
    %c0_14 = arith.constant 0 : index
    %20 = vector.load %arg6[%c0_13, %c0_14] : memref<128x128xbf16, #tpu.memory_space<vmem>>, vector<128x128xbf16>
    %cst_15 = arith.constant dense<0.000000e+00> : vector<128x128xf32>
    %21 = tpu.matmul %19, %20, %cst_15 {dimension_numbers = #tpu.dot_dimension_numbers<[1], [0], [0], [1], [0, 0, 1, 1], [], []>} : vector<128x128xbf16>, vector<128x128xbf16>, vector<128x128xf32> -> vector<128x128xf32>
    %22 = arith.truncf %18 : vector<128x128xf32> to vector<128x128xbf16>
    %c0_16 = arith.constant 0 : index
    %c0_17 = arith.constant 0 : index
    %23 = vector.load %arg7[%c0_16, %c0_17] : memref<128x128xbf16, #tpu.memory_space<vmem>>, vector<128x128xbf16>
    %cst_18 = arith.constant dense<0.000000e+00> : vector<128x128xf32>
    %24 = tpu.matmul %22, %23, %cst_18 {dimension_numbers = #tpu.dot_dimension_numbers<[1], [0], [0], [1], [0, 0, 1, 1], [], []>} : vector<128x128xbf16>, vector<128x128xbf16>, vector<128x128xf32> -> vector<128x128xf32>
    %25 = arith.addf %21, %24 : vector<128x128xf32>
    %26 = vector.broadcast %5 : vector<1x128xf32> to vector<128x128xf32>
    %27 = arith.addf %25, %26 : vector<128x128xf32>
    %28 = arith.truncf %27 : vector<128x128xf32> to vector<128x128xbf16>
    %cst_19 = arith.constant dense<0.000000e+00> : vector<128x128xf32>
    %29 = tpu.matmul %28, %2, %cst_19 {dimension_numbers = #tpu.dot_dimension_numbers<[1], [0], [0], [1], [0, 0, 1, 1], [], []>} : vector<128x128xbf16>, vector<128x128xbf16>, vector<128x128xf32> -> vector<128x128xf32>
    %30 = vector.broadcast %4 : vector<1x128xf32> to vector<128x128xf32>
    %31 = arith.addf %29, %30 : vector<128x128xf32>
    %c0_20 = arith.constant 0 : index
    %c0_21 = arith.constant 0 : index
    %32 = vector.load %arg9[%c0_20, %c0_21] : memref<128x128xf32, #tpu.memory_space<vmem>>, vector<128x128xf32>
    tpu.vector_store %arg9[%c0_20, %c0_21], %13 {strides = array<i32>} : memref<128x128xf32, #tpu.memory_space<vmem>>, vector<128x128xf32>,
    %c0_22 = arith.constant 0 : index
    %c0_23 = arith.constant 0 : index
    %33 = vector.load %arg10[%c0_22, %c0_23] : memref<128x128xf32, #tpu.memory_space<vmem>>, vector<128x128xf32>
    tpu.vector_store %arg10[%c0_22, %c0_23], %31 {strides = array<i32>} : memref<128x128xf32, #tpu.memory_space<vmem>>, vector<128x128xf32>,
    %c0_24 = arith.constant 0 : index
    %c0_25 = arith.constant 0 : index
    %34 = vector.load %arg11[%c0_24, %c0_25] : memref<128x128xf32, #tpu.memory_space<vmem>>, vector<128x128xf32>
    tpu.vector_store %arg11[%c0_24, %c0_25], %9 {strides = array<i32>} : memref<128x128xf32, #tpu.memory_space<vmem>>, vector<128x128xf32>,
    %c0_26 = arith.constant 0 : index
    %c0_27 = arith.constant 0 : index
    %35 = vector.load %arg12[%c0_26, %c0_27] : memref<128x128xf32, #tpu.memory_space<vmem>>, vector<128x128xf32>
    tpu.vector_store %arg12[%c0_26, %c0_27], %27 {strides = array<i32>} : memref<128x128xf32, #tpu.memory_space<vmem>>, vector<128x128xf32>,
    return
  }
  func.func @transform_0(%arg0: i32) -> (i32, i32) {
    %c0_i32 = arith.constant 0 : i32
    %c0_i32_0 = arith.constant 0 : i32
    return %arg0, %c0_i32 : i32, i32
  }
  func.func @transform_1(%arg0: i32) -> (i32, i32) {
    %c0_i32 = arith.constant 0 : i32
    %c0_i32_0 = arith.constant 0 : i32
    %c0_i32_1 = arith.constant 0 : i32
    return %c0_i32, %c0_i32_0 : i32, i32
  }
  func.func @transform_2(%arg0: i32) -> (i32, i32) {
    %c0_i32 = arith.constant 0 : i32
    %c0_i32_0 = arith.constant 0 : i32
    %c0_i32_1 = arith.constant 0 : i32
    return %c0_i32, %c0_i32_0 : i32, i32
  }
  func.func @transform_3(%arg0: i32) -> (i32, i32) {
    %c0_i32 = arith.constant 0 : i32
    %c0_i32_0 = arith.constant 0 : i32
    %c0_i32_1 = arith.constant 0 : i32
    return %c0_i32, %c0_i32_0 : i32, i32
  }
  func.func @transform_4(%arg0: i32) -> (i32, i32) {
    %c0_i32 = arith.constant 0 : i32
    %c0_i32_0 = arith.constant 0 : i32
    %c0_i32_1 = arith.constant 0 : i32
    return %c0_i32, %c0_i32_0 : i32, i32
  }
  func.func @transform_5(%arg0: i32) -> (i32, i32) {
    %c0_i32 = arith.constant 0 : i32
    %c0_i32_0 = arith.constant 0 : i32
    %c0_i32_1 = arith.constant 0 : i32
    return %c0_i32, %c0_i32_0 : i32, i32
  }
  func.func @transform_6(%arg0: i32) -> (i32, i32) {
    %c0_i32 = arith.constant 0 : i32
    %c0_i32_0 = arith.constant 0 : i32
    %c0_i32_1 = arith.constant 0 : i32
    return %c0_i32, %c0_i32_0 : i32, i32
  }
  func.func @transform_7(%arg0: i32) -> (i32, i32) {
    %c0_i32 = arith.constant 0 : i32
    %c0_i32_0 = arith.constant 0 : i32
    %c0_i32_1 = arith.constant 0 : i32
    return %c0_i32, %c0_i32_0 : i32, i32
  }
  func.func @transform_8(%arg0: i32) -> (i32, i32) {
    %c0_i32 = arith.constant 0 : i32
    %c0_i32_0 = arith.constant 0 : i32
    return %arg0, %c0_i32 : i32, i32
  }
  func.func @transform_9(%arg0: i32) -> (i32, i32) {
    %c0_i32 = arith.constant 0 : i32
    %c0_i32_0 = arith.constant 0 : i32
    return %arg0, %c0_i32 : i32, i32
  }
  func.func @transform_10(%arg0: i32) -> (i32, i32) {
    %c0_i32 = arith.constant 0 : i32
    %c0_i32_0 = arith.constant 0 : i32
    return %arg0, %c0_i32 : i32, i32
  }
  func.func @transform_11(%arg0: i32) -> (i32, i32) {
    %c0_i32 = arith.constant 0 : i32
    %c0_i32_0 = arith.constant 0 : i32
    return %arg0, %c0_i32 : i32, i32
  }
}

</mosaic_0001>

<bundles_post_ra>
// kernel: ae_builder_forward.1
= control target key start
LH: loop header
LB: loop body
LE: loop exit
PB: predicated region body
PF: predicated region fallthrough
CT: control target
= control target key end

     0   :  { %s2184_s17 = smov 0   ;;  %s2573_s0 = inlined_call_operand.vmem [shape: bf16[256,128], index: 0, kind: input, shape index: {}]   ;;  %s2574_s1 = inlined_call_operand.vmem [shape: bf16[128,128], index: 1, kind: input, shape index: {}]   ;;  %s2575_s2 = inlined_call_operand.vmem [shape: f32[1,128], index: 2, kind: input, shape index: {}]   ;;  %s2576_s3 = inlined_call_operand.vmem [shape: bf16[128,128], index: 3, kind: input, shape index: {}]   ;;  %s2577_s4 = inlined_call_operand.vmem [shape: f32[1,128], index: 4, kind: input, shape index: {}]   ;;  %s2578_s5 = inlined_call_operand.vmem [shape: bf16[128,128], index: 5, kind: input, shape index: {}]   ;;  %s2579_s6 = inlined_call_operand.vmem [shape: bf16[128,128], index: 6, kind: input, shape index: {}]   ;;  %s2580_s7 = inlined_call_operand.vmem [shape: f32[1,128], index: 7, kind: input, shape index: {}]   ;;  %s2581_s8 = inlined_call_operand.vmem [shape: f32[256,128], index: 8, kind: output, shape index: {0}]   ;;  %s2582_s9 = inlined_call_operand.vmem [shape: f32[256,128], index: 9, kind: output, shape index: {1}]   ;;  %s2583_s10 = inlined_call_operand.vmem [shape: f32[256,128], index: 10, kind: output, shape index: {2}]   ;;  %s2584_s11 = inlined_call_operand.vmem [shape: f32[256,128], index: 11, kind: output, shape index: {3}]  }
   0x1 LB: > { %s1656_s18 = sadd.s32 4294967295, %s2122_s17   ;;  %p1660_p0 = scmp.ge.s32.totalorder %s2122_s17, 1  ;;  %s2122_s17 = sphi %s2184_s17, %s22_s17  }
   0x2   : > { %p345_p1 = scmp.lt.s32.totalorder %s2122_s17, 3 }
   0x4   : > { %p346_p2 = pnand %p1660_p0, %p345_p1 }
   0x5   : > { %s1661_s21 = sshll.u32 (!%p346_p2), %s1656_s18, 4 }
   0x6   : > { %349 = sbr.rel (%p346_p2) target bundleno = 1116 (0x45c), region = 52  ;;  %p401_p3 = scmp.lt.s32.totalorder (!%p346_p2), %s1661_s21, 31 }
   0xb   : > { %v2012_v0 = vld [vmem:[%s2574_s1 + $0x38] sm:$0xff]   ;;  %v2013_v1 = vld [vmem:[%s2574_s1 + $0x30] sm:$0xff]   ;;  %s2586_s21 = smov (!%p401_p3, %s1661_s21), 31  ;;  %v2014_v2 = vld [vmem:[%s2574_s1 + $0x28] sm:$0xff]  }
   0xc   : > { %1812 = vmatprep.subr.bf16.mxu0 %v2012_v0  ;;  %s1662_s26 = sshll.u32 %s2586_s21, 2  ;;  %v2015_v3 = vld [vmem:[%s2574_s1 + $0x20] sm:$0xff]   ;;  %v2016_v5 = vld [vmem:[%s2574_s1 + $0x18] sm:$0xff]   ;;  %v2017_v6 = vld [vmem:[%s2574_s1 + $0x10] sm:$0xff]   ;;  %s2299_s24 = sshll.u32 %s2586_s21, 3 }
   0xd   : > { %1813 = vmatpush3.bf16.msra.mxu0 %v2012_v0  ;;  %s2207_s29 = scalar_lea.vmem %s2573_s0, %s1662_s26  ;;  %v2222_v7 = vld [vmem:[%s2576_s3 + $0x38] sm:$0xff]   ;;  %v2227_v8 = vld [vmem:[%s2576_s3 + $0x30] sm:$0xff]   ;;  %v2018_v9 = vld [vmem:[%s2574_s1 + $0x8] sm:$0xff]   ;;  %s2307_s27 = scalar_lea.vmem %s2583_s10, %s2299_s24 }
   0xe   : > { %1814 = vmatprep.subr.bf16.mxu0 %v2013_v1  ;;  %v2020_v4 = vld [vmem:[%s2207_s29] sm:$0xff]   ;;  %1844 = vmatprep.subr.bf16.mxu1 %v2222_v7  ;;  %v2021_v11 = vld [vmem:[%s2207_s29 + $0x8] sm:$0xff]   ;;  %v2022_v12 = vld [vmem:[%s2207_s29 + $0x10] sm:$0xff]   ;;  %s2376_s19 = scalar_lea.vmem %s2581_s8, %s2299_s24  ;;  %s2498_s15 = scalar_lea.vmem %s2584_s11, %s2299_s24 }
   0xf   : > { %1828 = vmatprep.mubr.bf16.mxu0 %v2020_v4  ;;  %1845 = vmatpush3.bf16.msra.mxu1 %v2222_v7  ;;  %v2019_v10 = vld [vmem:[%s2574_s1] sm:$0xff]   ;;  %v2023_v13 = vld [vmem:[%s2207_s29 + $0x18] sm:$0xff]   ;;  %v2025_v15 = vld [vmem:[%s2207_s29 + $0x28] sm:$0xff]  }
  0x10   : > { %1846 = vmatprep.subr.bf16.mxu1 %v2227_v8  ;;  %v2024_v14 = vld [vmem:[%s2207_s29 + $0x20] sm:$0xff]   ;;  %v2026_v16 = vld [vmem:[%s2207_s29 + $0x30] sm:$0xff]   ;;  %v2027_v17 = vld [vmem:[%s2207_s29 + $0x38] sm:$0xff]  }
  0x11   : > { %1815 = vmatpush3.bf16.msra.mxu0 %v2013_v1  ;;  %v2249_v18 = vld [vmem:[%s2576_s3 + $0x28] sm:$0xff]   ;;  %v2256_v19 = vld [vmem:[%s2576_s3 + $0x20] sm:$0xff]   ;;  %v2263_v20 = vld [vmem:[%s2576_s3 + $0x18] sm:$0xff]  }
  0x12   : > { %1816 = vmatprep.subr.bf16.mxu0 %v2014_v2  ;;  %v2270_v21 = vld [vmem:[%s2576_s3 + $0x10] sm:$0xff]   ;;  %v2277_v22 = vld [vmem:[%s2576_s3 + $0x8] sm:$0xff]   ;;  %v2284_v23 = vld [vmem:[%s2576_s3] sm:$0xff]  }
  0x13   : > { %1847 = vmatpush3.bf16.msra.mxu1 %v2227_v8  ;;  %v2291_v24 = vld [vmem:[%s2575_s2] ss:$0 sm:$0xff] }
  0x14   : > { %1848 = vmatprep.subr.bf16.mxu1 %v2249_v18 }
  0x15   : > { %1817 = vmatpush3.bf16.msra.mxu0 %v2014_v2 }
  0x16   : > { %1818 = vmatprep.subr.bf16.mxu0 %v2015_v3 }
  0x17   : > { %1849 = vmatpush3.bf16.msra.mxu1 %v2249_v18 }
  0x18   : > { %1850 = vmatprep.subr.bf16.mxu1 %v2256_v19 }
  0x19   : > { %1819 = vmatpush3.bf16.msra.mxu0 %v2015_v3 }
  0x1a   : > { %1820 = vmatprep.subr.bf16.mxu0 %v2016_v5 }
  0x1b   : > { %1851 = vmatpush3.bf16.msra.mxu1 %v2256_v19 }
  0x1c   : > { %1852 = vmatprep.subr.bf16.mxu1 %v2263_v20 }
  0x1d   : > { %1821 = vmatpush3.bf16.msra.mxu0 %v2016_v5 }
  0x1e   : > { %1822 = vmatprep.subr.bf16.mxu0 %v2017_v6 }
  0x1f   : > { %1853 = vmatpush3.bf16.msra.mxu1 %v2263_v20 }
  0x20   : > { %1854 = vmatprep.subr.bf16.mxu1 %v2270_v21 }
  0x21   : > { %1823 = vmatpush3.bf16.msra.mxu0 %v2017_v6 }
  0x22   : > { %1824 = vmatprep.subr.bf16.mxu0 %v2018_v9 }
  0x23   : > { %1855 = vmatpush3.bf16.msra.mxu1 %v2270_v21 }
  0x24   : > { %1856 = vmatprep.subr.bf16.mxu1 %v2277_v22 }
  0x25   : > { %1825 = vmatpush3.bf16.msra.mxu0 %v2018_v9 }
  0x26   : > { %1826 = vmatprep.subr.bf16.mxu0 %v2019_v10 }
  0x27   : > { %1857 = vmatpush3.bf16.msra.mxu1 %v2277_v22 }
  0x28   : > { %1858 = vmatprep.subr.bf16.mxu1 %v2284_v23 }
  0x29   : > { %1827 = vmatpush3.bf16.msra.mxu0 %v2019_v10 }
  0x2a   : > { %1876 = vmatprep.subr.bf16.mxu0 %v2012_v0 }
  0x2b   : > { %1859 = vmatpush3.bf16.msra.mxu1 %v2284_v23 }
  0x2c   : > { %1829 = vmatmul.mubr.bf16.vlgmr.msra.gmra.mxu0 %v2021_v11 }
  0x2d   : > { %1832 = vmatprep.mubr.bf16.mxu0 %v2022_v12  ;;  %1877 = vmatpush3.bf16.msra.mxu0 %v2012_v0 }
  0x2e   : > { %1878 = vmatprep.subr.bf16.mxu0 %v2013_v1 }
  0x31   : > { %1879 = vmatpush3.bf16.msra.mxu0 %v2013_v1 }
  0x32   : > { %1880 = vmatprep.subr.bf16.mxu0 %v2014_v2 }
  0x34   : > { %1833 = vmatmul.mubr.bf16.gmra.mxu0 %v2023_v13 }
  0x35   : > { %1836 = vmatprep.mubr.bf16.mxu0 %v2024_v14  ;;  %1881 = vmatpush3.bf16.msra.mxu0 %v2014_v2 }
  0x36   : > { %1882 = vmatprep.subr.bf16.mxu0 %v2015_v3 }
  0x39   : > { %1883 = vmatpush3.bf16.msra.mxu0 %v2015_v3 }
  0x3a   : > { %1884 = vmatprep.subr.bf16.mxu0 %v2016_v5 }
  0x3c   : > { %1837 = vmatmul.mubr.bf16.gmra.mxu0 %v2025_v15 }
  0x3d   : > { %1840 = vmatprep.mubr.bf16.mxu0 %v2026_v16  ;;  %1885 = vmatpush3.bf16.msra.mxu0 %v2016_v5 }
  0x3e   : > { %1886 = vmatprep.subr.bf16.mxu0 %v2017_v6 }
  0x41   : > { %1887 = vmatpush3.bf16.msra.mxu0 %v2017_v6 }
  0x42   : > { %1888 = vmatprep.subr.bf16.mxu0 %v2018_v9 }
  0x44   : > { %1841 = vmatmul.mubr.bf16.gmra.mxu0 %v2027_v17 }
  0x45   : > { %1889 = vmatpush3.bf16.msra.mxu0 %v2018_v9 }
  0x46   : > { %1890 = vmatprep.subr.bf16.mxu0 %v2019_v10 }
  0x49   : > { %1891 = vmatpush3.bf16.msra.mxu0 %v2019_v10 }
  0xec   : > { %v1830_v25 = vpop.f32.mrf.mxu0 }
  0xed   : > { %v627_v26 = vadd.f32 %v1830_v25, %v2291_v24 }
  0xee   : > { %v618_v27 = vpop.f32.mrf.mxu0 }
  0xef   : > { %2052 = vtanh.f32 %v627_v26  ;;  %v619_v28 = vadd.f32 %v2291_v24, %v618_v27  ;;  %v2036_v26 = vld [vmem:[%s2578_s5 + $0x38] sm:$0xff]  }
  0xf0   : > { %v1831_v29 = vpop.f32.mrf.mxu0  ;;  %1940 = vmatprep.subr.bf16.mxu0 %v2036_v26  ;;  %v2044_v27 = vld [vmem:[%s2579_s6 + $0x38] sm:$0xff]  }
  0xf1   : > { %2054 = vtanh.f32 %v619_v28  ;;  %v630_v30 = vadd.f32 %v1831_v29, %v2291_v24  ;;  %v2045_v28 = vld [vmem:[%s2579_s6 + $0x30] sm:$0xff]   ;;  %1908 = vmatprep.subr.bf16.mxu1 %v2044_v27  ;;  %v2370_v29 = vld [vmem:[%s2577_s4] ss:$0 sm:$0xff] }
  0xf2   : > { %v621_v31 = vpop.f32.mrf.mxu0 }
  0xf3   : > { %2056 = vtanh.f32 %v630_v30  ;;  %v622_v32 = vadd.f32 %v2291_v24, %v621_v31 }
  0xf4   : > { %v1834_v33 = vpop.f32.mrf.mxu0 }
  0xf5   : > { %2058 = vtanh.f32 %v622_v32  ;;  %v643_v34 = vadd.f32 %v1834_v33, %v2291_v24 }
  0xf6   : > { %v634_v35 = vpop.f32.mrf.mxu0 }
  0xf7   : > { %2060 = vtanh.f32 %v643_v34  ;;  %v635_v36 = vadd.f32 %v2291_v24, %v634_v35 }
  0xf8   : > { %v1835_v37 = vpop.f32.mrf.mxu0 }
  0xf9   : > { %2062 = vtanh.f32 %v635_v36  ;;  %v646_v38 = vadd.f32 %v1835_v37, %v2291_v24 }
  0xfa   : > { %v637_v39 = vpop.f32.mrf.mxu0 }
  0xfb   : > { %2064 = vtanh.f32 %v646_v38  ;;  %v638_v40 = vadd.f32 %v2291_v24, %v637_v39 }
  0xfc   : > { %v2053_v41 = vpop.eup %2052  ;;  %v1838_v42 = vpop.f32.mrf.mxu0 }
  0xfd   : > { %1468 = vst [vmem:[%s2307_s27 + $0x10] sm:$0xff] %v2053_v41  ;;  %2066 = vtanh.f32 %v638_v40  ;;  %v659_v43 = vadd.f32 %v1838_v42, %v2291_v24 }
  0xfe   : > { %v2055_v44 = vpop.eup %2054  ;;  %v650_v45 = vpop.f32.mrf.mxu0 }
  0xff   : > { %1466 = vst [vmem:[%s2307_s27] sm:$0xff] %v2055_v44  ;;  %2068 = vtanh.f32 %v659_v43  ;;  %v651_v46 = vadd.f32 %v2291_v24, %v650_v45  ;;  %v2037_v43 = vld [vmem:[%s2578_s5 + $0x30] sm:$0xff]  }
 0x100   : > { %v2057_v47 = vpop.eup %2056  ;;  %v1839_v48 = vpop.f32.mrf.mxu0 }
 0x101   : > { %1469 = vst [vmem:[%s2307_s27 + $0x18] sm:$0xff] %v2057_v47  ;;  %2070 = vtanh.f32 %v651_v46  ;;  %v662_v49 = vadd.f32 %v1839_v48, %v2291_v24  ;;  %v2320_v56 = vpack.c.bf16 %v2057_v47, %v2053_v41  ;;  %v2038_v48 = vld [vmem:[%s2578_s5 + $0x28] sm:$0xff]  }
 0x102   : > { %v2059_v50 = vpop.eup %2058  ;;  %v653_v51 = vpop.f32.mrf.mxu0 }
 0x103   : > { %1467 = vst [vmem:[%s2307_s27 + $0x8] sm:$0xff] %v2059_v50  ;;  %2072 = vtanh.f32 %v662_v49  ;;  %v654_v52 = vadd.f32 %v2291_v24, %v653_v51  ;;  %v2318_v53 = vpack.c.bf16 %v2059_v50, %v2055_v44 }
 0x104   : > { %v2061_v54 = vpop.eup %2060  ;;  %v1842_v55 = vpop.f32.mrf.mxu0 }
 0x105   : > { %1472 = vst [vmem:[%s2307_s27 + $0x30] sm:$0xff] %v2061_v54  ;;  %2074 = vtanh.f32 %v654_v52  ;;  %v675_v57 = vadd.f32 %v1842_v55, %v2291_v24  ;;  %1860 = vmatprep.mubr.bf16.mxu1 %v2318_v53 }
 0x106   : > { %v2063_v58 = vpop.eup %2062  ;;  %v666_v59 = vpop.f32.mrf.mxu0  ;;  %1861 = vmatmul.mubr.bf16.vlgmr.msra.gmra.mxu1 %v2320_v56 }
 0x107   : > { %1470 = vst [vmem:[%s2307_s27 + $0x20] sm:$0xff] %v2063_v58  ;;  %2076 = vtanh.f32 %v675_v57  ;;  %v667_v60 = vadd.f32 %v2291_v24, %v666_v59  ;;  %1909 = vmatpush3.bf16.msra.mxu1 %v2044_v27  ;;  %v2039_v57 = vld [vmem:[%s2578_s5 + $0x20] sm:$0xff]  }
 0x108   : > { %v2065_v61 = vpop.eup %2064  ;;  %v1843_v62 = vpop.f32.mrf.mxu0  ;;  %1910 = vmatprep.subr.bf16.mxu1 %v2045_v28 }
 0x109   : > { %1473 = vst [vmem:[%s2307_s27 + $0x38] sm:$0xff] %v2065_v61  ;;  %2078 = vtanh.f32 %v667_v60  ;;  %v678_v63 = vadd.f32 %v1843_v62, %v2291_v24  ;;  %v2334_v5 = vpack.c.bf16 %v2065_v61, %v2061_v54  ;;  %v2040_v62 = vld [vmem:[%s2578_s5 + $0x18] sm:$0xff]  }
 0x10a   : > { %v2067_v0 = vpop.eup %2066  ;;  %v669_v1 = vpop.f32.mrf.mxu0 }
 0x10b   : > { %1471 = vst [vmem:[%s2307_s27 + $0x28] sm:$0xff] %v2067_v0  ;;  %2080 = vtanh.f32 %v678_v63  ;;  %v670_v2 = vadd.f32 %v2291_v24, %v669_v1  ;;  %v2332_v3 = vpack.c.bf16 %v2067_v0, %v2063_v58  ;;  %1911 = vmatpush3.bf16.msra.mxu1 %v2045_v28 }
 0x10c   : > { %v2069_v4 = vpop.eup %2068 }
 0x10d   : > { %1476 = vst [vmem:[%s2307_s27 + $0x50] sm:$0xff] %v2069_v4  ;;  %2082 = vtanh.f32 %v670_v2  ;;  %1864 = vmatprep.mubr.bf16.mxu1 %v2332_v3 }
 0x10e   : > { %v2071_v6 = vpop.eup %2070  ;;  %1865 = vmatmul.mubr.bf16.gmra.mxu1 %v2334_v5 }
 0x10f   : > { %1474 = vst [vmem:[%s2307_s27 + $0x40] sm:$0xff] %v2071_v6 }
 0x110   : > { %v2073_v9 = vpop.eup %2072 }
 0x111   : > { %1477 = vst [vmem:[%s2307_s27 + $0x58] sm:$0xff] %v2073_v9  ;;  %v2344_v13 = vpack.c.bf16 %v2073_v9, %v2069_v4  ;;  %v2041_v9 = vld [vmem:[%s2578_s5 + $0x10] sm:$0xff]  }
 0x112   : > { %v2075_v10 = vpop.eup %2074 }
 0x113   : > { %1475 = vst [vmem:[%s2307_s27 + $0x48] sm:$0xff] %v2075_v10  ;;  %v2342_v11 = vpack.c.bf16 %v2075_v10, %v2071_v6 }
 0x114   : > { %v2077_v12 = vpop.eup %2076 }
 0x115   : > { %1480 = vst [vmem:[%s2307_s27 + $0x70] sm:$0xff] %v2077_v12  ;;  %1868 = vmatprep.mubr.bf16.mxu1 %v2342_v11 }
 0x116   : > { %v2079_v14 = vpop.eup %2078  ;;  %1869 = vmatmul.mubr.bf16.gmra.mxu1 %v2344_v13 }
 0x117   : > { %1478 = vst [vmem:[%s2307_s27 + $0x60] sm:$0xff] %v2079_v14 }
 0x118   : > { %v2081_v15 = vpop.eup %2080 }
 0x119   : > { %1481 = vst [vmem:[%s2307_s27 + $0x78] sm:$0xff] %v2081_v15  ;;  %v2354_v25 = vpack.c.bf16 %v2081_v15, %v2077_v12 }
 0x11a   : > { %v2083_v16 = vpop.eup %2082 }
 0x11b   : > { %1479 = vst [vmem:[%s2307_s27 + $0x68] sm:$0xff] %v2083_v16  ;;  %v2352_v17 = vpack.c.bf16 %v2083_v16, %v2079_v14  ;;  %v2042_v16 = vld [vmem:[%s2578_s5 + $0x8] sm:$0xff]  }
 0x11d   : > { %1872 = vmatprep.mubr.bf16.mxu1 %v2352_v17 }
 0x11e   : > { %1873 = vmatmul.mubr.bf16.gmra.mxu1 %v2354_v25 }
 0x1c6   : > { %v1862_v30 = vpop.f32.mrf.mxu1 }
 0x1c7   : > { %v802_v31 = vadd.f32 %v1862_v30, %v2370_v29  ;;  %v2043_v30 = vld [vmem:[%s2578_s5] sm:$0xff]  }
 0x1c8   : > { %v793_v32 = vpop.f32.mrf.mxu1 }
 0x1c9   : > { %1436 = vst [vmem:[%s2376_s19 + $0x10] sm:$0xff] %v802_v31  ;;  %v794_v33 = vadd.f32 %v2370_v29, %v793_v32 }
 0x1ca   : > { %v1863_v34 = vpop.f32.mrf.mxu1 }
 0x1cb   : > { %1434 = vst [vmem:[%s2376_s19] sm:$0xff] %v794_v33  ;;  %v805_v35 = vadd.f32 %v1863_v34, %v2370_v29 }
 0x1cc   : > { %v796_v36 = vpop.f32.mrf.mxu1 }
 0x1cd   : > { %1437 = vst [vmem:[%s2376_s19 + $0x18] sm:$0xff] %v805_v35  ;;  %v797_v37 = vadd.f32 %v2370_v29, %v796_v36  ;;  %v857_v41 = vpack.c.bf16 %v805_v35, %v802_v31 }
 0x1ce   : > { %v1866_v38 = vpop.f32.mrf.mxu1 }
 0x1cf   : > { %v856_v39 = vpack.c.bf16 %v797_v37, %v794_v33  ;;  %1435 = vst [vmem:[%s2376_s19 + $0x8] sm:$0xff] %v797_v37  ;;  %v818_v40 = vadd.f32 %v1866_v38, %v2370_v29 }
 0x1d0   : > { %v809_v42 = vpop.f32.mrf.mxu1 }
 0x1d1   : > { %1440 = vst [vmem:[%s2376_s19 + $0x30] sm:$0xff] %v818_v40  ;;  %v810_v44 = vadd.f32 %v2370_v29, %v809_v42  ;;  %1892 = vmatprep.mubr.bf16.mxu0 %v856_v39 }
 0x1d2   : > { %v1867_v45 = vpop.f32.mrf.mxu1  ;;  %1893 = vmatmul.mubr.bf16.vlgmr.msra.gmra.mxu0 %v857_v41 }
 0x1d3   : > { %1438 = vst [vmem:[%s2376_s19 + $0x20] sm:$0xff] %v810_v44  ;;  %v821_v46 = vadd.f32 %v1867_v45, %v2370_v29  ;;  %1941 = vmatpush3.bf16.msra.mxu0 %v2036_v26 }
 0x1d4   : > { %v812_v47 = vpop.f32.mrf.mxu1  ;;  %1942 = vmatprep.subr.bf16.mxu0 %v2037_v43 }
 0x1d5   : > { %1441 = vst [vmem:[%s2376_s19 + $0x38] sm:$0xff] %v821_v46  ;;  %v813_v49 = vadd.f32 %v2370_v29, %v812_v47  ;;  %v859_v54 = vpack.c.bf16 %v821_v46, %v818_v40 }
 0x1d6   : > { %v1870_v50 = vpop.f32.mrf.mxu1 }
 0x1d7   : > { %v858_v51 = vpack.c.bf16 %v813_v49, %v810_v44  ;;  %1439 = vst [vmem:[%s2376_s19 + $0x28] sm:$0xff] %v813_v49  ;;  %v834_v52 = vadd.f32 %v1870_v50, %v2370_v29  ;;  %1943 = vmatpush3.bf16.msra.mxu0 %v2037_v43 }
 0x1d8   : > { %v825_v55 = vpop.f32.mrf.mxu1  ;;  %1944 = vmatprep.subr.bf16.mxu0 %v2038_v48 }
 0x1d9   : > { %1444 = vst [vmem:[%s2376_s19 + $0x50] sm:$0xff] %v834_v52  ;;  %v826_v58 = vadd.f32 %v2370_v29, %v825_v55  ;;  %1896 = vmatprep.mubr.bf16.mxu0 %v858_v51 }
 0x1da   : > { %v1871_v59 = vpop.f32.mrf.mxu1  ;;  %1897 = vmatmul.mubr.bf16.gmra.mxu0 %v859_v54 }
 0x1db   : > { %1442 = vst [vmem:[%s2376_s19 + $0x40] sm:$0xff] %v826_v58  ;;  %v837_v60 = vadd.f32 %v1871_v59, %v2370_v29  ;;  %1945 = vmatpush3.bf16.msra.mxu0 %v2038_v48 }
 0x1dc   : > { %v828_v61 = vpop.f32.mrf.mxu1  ;;  %1946 = vmatprep.subr.bf16.mxu0 %v2039_v57 }
 0x1dd   : > { %1445 = vst [vmem:[%s2376_s19 + $0x58] sm:$0xff] %v837_v60  ;;  %v829_v63 = vadd.f32 %v2370_v29, %v828_v61  ;;  %v861_v4 = vpack.c.bf16 %v837_v60, %v834_v52 }
 0x1de   : > { %v1874_v0 = vpop.f32.mrf.mxu1 }
 0x1df   : > { %v860_v1 = vpack.c.bf16 %v829_v63, %v826_v58  ;;  %1443 = vst [vmem:[%s2376_s19 + $0x48] sm:$0xff] %v829_v63  ;;  %v850_v2 = vadd.f32 %v1874_v0, %v2370_v29  ;;  %1947 = vmatpush3.bf16.msra.mxu0 %v2039_v57 }
 0x1e0   : > { %v841_v6 = vpop.f32.mrf.mxu1  ;;  %1948 = vmatprep.subr.bf16.mxu0 %v2040_v62 }
 0x1e1   : > { %1448 = vst [vmem:[%s2376_s19 + $0x70] sm:$0xff] %v850_v2  ;;  %v842_v10 = vadd.f32 %v2370_v29, %v841_v6  ;;  %1900 = vmatprep.mubr.bf16.mxu0 %v860_v1 }
 0x1e2   : > { %v1875_v12 = vpop.f32.mrf.mxu1  ;;  %1901 = vmatmul.mubr.bf16.gmra.mxu0 %v861_v4 }
 0x1e3   : > { %1446 = vst [vmem:[%s2376_s19 + $0x60] sm:$0xff] %v842_v10  ;;  %v853_v14 = vadd.f32 %v1875_v12, %v2370_v29  ;;  %1949 = vmatpush3.bf16.msra.mxu0 %v2040_v62 }
 0x1e4   : > { %v844_v15 = vpop.f32.mrf.mxu1  ;;  %1950 = vmatprep.subr.bf16.mxu0 %v2041_v9 }
 0x1e5   : > { %1449 = vst [vmem:[%s2376_s19 + $0x78] sm:$0xff] %v853_v14  ;;  %v845_v26 = vadd.f32 %v2370_v29, %v844_v15  ;;  %v863_v28 = vpack.c.bf16 %v853_v14, %v850_v2 }
 0x1e7   : > { %v862_v27 = vpack.c.bf16 %v845_v26, %v842_v10  ;;  %1447 = vst [vmem:[%s2376_s19 + $0x68] sm:$0xff] %v845_v26  ;;  %1951 = vmatpush3.bf16.msra.mxu0 %v2041_v9  ;;  %s2536_s19 = scalar_lea.vmem %s2582_s9, %s2299_s24 }
 0x1e8   : > { %1952 = vmatprep.subr.bf16.mxu0 %v2042_v16 }
 0x1e9   : > { %1904 = vmatprep.mubr.bf16.mxu0 %v862_v27 }
 0x1ea   : > { %1905 = vmatmul.mubr.bf16.gmra.mxu0 %v863_v28 }
 0x1eb   : > { %1953 = vmatpush3.bf16.msra.mxu0 %v2042_v16  ;;  %1956 = vmatprep.mubr.bf16.mxu0 %v2318_v53  ;;  %v2046_v53 = vld [vmem:[%s2579_s6 + $0x28] sm:$0xff]  }
 0x1ec   : > { %1954 = vmatprep.subr.bf16.mxu0 %v2043_v30  ;;  %1912 = vmatprep.subr.bf16.mxu1 %v2046_v53 }
 0x1ed   : > { %1913 = vmatpush3.bf16.msra.mxu1 %v2046_v53 }
 0x1ef   : > { %1955 = vmatpush3.bf16.msra.mxu0 %v2043_v30 }
 0x1f2   : > { %1957 = vmatmul.mubr.bf16.vlgmr.msra.gmra.mxu0 %v2320_v56  ;;  %v2047_v56 = vld [vmem:[%s2579_s6 + $0x20] sm:$0xff]  }
 0x1f3   : > { %1960 = vmatprep.mubr.bf16.mxu0 %v2332_v3  ;;  %1914 = vmatprep.subr.bf16.mxu1 %v2047_v56  ;;  %v2048_v3 = vld [vmem:[%s2579_s6 + $0x18] sm:$0xff]  }
 0x1f4   : > { %1915 = vmatpush3.bf16.msra.mxu1 %v2047_v56 }
 0x1f5   : > { %1916 = vmatprep.subr.bf16.mxu1 %v2048_v3 }
 0x1f8   : > { %1917 = vmatpush3.bf16.msra.mxu1 %v2048_v3 }
 0x1fa   : > { %1961 = vmatmul.mubr.bf16.gmra.mxu0 %v2334_v5  ;;  %v2049_v5 = vld [vmem:[%s2579_s6 + $0x10] sm:$0xff]  }
 0x1fb   : > { %1964 = vmatprep.mubr.bf16.mxu0 %v2342_v11  ;;  %1918 = vmatprep.subr.bf16.mxu1 %v2049_v5  ;;  %v2050_v11 = vld [vmem:[%s2579_s6 + $0x8] sm:$0xff]  }
 0x1fc   : > { %1919 = vmatpush3.bf16.msra.mxu1 %v2049_v5 }
 0x1fd   : > { %1920 = vmatprep.subr.bf16.mxu1 %v2050_v11 }
 0x200   : > { %1921 = vmatpush3.bf16.msra.mxu1 %v2050_v11 }
 0x202   : > { %1965 = vmatmul.mubr.bf16.gmra.mxu0 %v2344_v13  ;;  %v2051_v13 = vld [vmem:[%s2579_s6] sm:$0xff]  }
 0x203   : > { %1968 = vmatprep.mubr.bf16.mxu0 %v2352_v17  ;;  %1922 = vmatprep.subr.bf16.mxu1 %v2051_v13 }
 0x204   : > { %1923 = vmatpush3.bf16.msra.mxu1 %v2051_v13 }
 0x205   : > { %1972 = vmatprep.subr.bf16.mxu1 %v2222_v7 }
 0x20a   : > { %1969 = vmatmul.mubr.bf16.gmra.mxu0 %v2354_v25 }
 0x292   : > { %v1894_v17 = vpop.f32.mrf.mxu0 }
 0x293   : > { %v907_v34 = vadd.f32 %v1894_v17, %v2291_v24 }
 0x294   : > { %v898_v25 = vpop.f32.mrf.mxu0 }
 0x295   : > { %v899_v31 = vadd.f32 %v2291_v24, %v898_v25 }
 0x296   : > { %v1895_v32 = vpop.f32.mrf.mxu0 }
 0x297   : > { %v910_v33 = vadd.f32 %v1895_v32, %v2291_v24  ;;  %2084 = vtanh.f32 %v899_v31  ;;  %v2492_v32 = vld [vmem:[%s2580_s7] ss:$0 sm:$0xff] }
 0x298   : > { %v901_v35 = vpop.f32.mrf.mxu0 }
 0x299   : > { %v902_v36 = vadd.f32 %v2291_v24, %v901_v35  ;;  %2086 = vtanh.f32 %v910_v33 }
 0x29a   : > { %v1898_v37 = vpop.f32.mrf.mxu0 }
 0x29b   : > { %2088 = vtanh.f32 %v902_v36  ;;  %v923_v42 = vadd.f32 %v1898_v37, %v2291_v24 }
 0x29c   : > { %2090 = vtanh.f32 %v907_v34  ;;  %v914_v38 = vpop.f32.mrf.mxu0 }
 0x29d   : > { %v915_v39 = vadd.f32 %v2291_v24, %v914_v38 }
 0x29e   : > { %v1899_v40 = vpop.f32.mrf.mxu0 }
 0x29f   : > { %v926_v41 = vadd.f32 %v1899_v40, %v2291_v24  ;;  %2092 = vtanh.f32 %v915_v39 }
 0x2a0   : > { %v917_v43 = vpop.f32.mrf.mxu0 }
 0x2a1   : > { %v918_v44 = vadd.f32 %v2291_v24, %v917_v43  ;;  %2094 = vtanh.f32 %v926_v41 }
 0x2a2   : > { %v1902_v45 = vpop.f32.mrf.mxu0 }
 0x2a3   : > { %2096 = vtanh.f32 %v918_v44  ;;  %v939_v54 = vadd.f32 %v1902_v45, %v2291_v24 }
 0x2a4   : > { %2098 = vtanh.f32 %v923_v42  ;;  %v930_v46 = vpop.f32.mrf.mxu0  ;;  %v2085_v48 = vpop.eup %2084 }
 0x2a5   : > { %v931_v47 = vadd.f32 %v2291_v24, %v930_v46 }
 0x2a6   : > { %v1903_v49 = vpop.f32.mrf.mxu0  ;;  %v2087_v50 = vpop.eup %2086 }
 0x2a7   : > { %v942_v51 = vadd.f32 %v1903_v49, %v2291_v24  ;;  %2100 = vtanh.f32 %v931_v47 }
 0x2a8   : > { %v2089_v52 = vpop.eup %2088  ;;  %v933_v55 = vpop.f32.mrf.mxu0 }
 0x2a9   : > { %v2091_v57 = vpop.eup %2090  ;;  %v934_v58 = vadd.f32 %v2291_v24, %v933_v55  ;;  %v993_v59 = vpack.c.bf16 %v2089_v52, %v2085_v48  ;;  %2102 = vtanh.f32 %v942_v51 }
 0x2aa   : > { %v1906_v60 = vpop.f32.mrf.mxu0  ;;  %v994_v61 = vpack.c.bf16 %v2087_v50, %v2091_v57 }
 0x2ab   : > { %2104 = vtanh.f32 %v934_v58  ;;  %1924 = vmatprep.mubr.bf16.mxu1 %v993_v59  ;;  %v955_v9 = vadd.f32 %v1906_v60, %v2291_v24 }
 0x2ac   : > { %2106 = vtanh.f32 %v939_v54  ;;  %v946_v62 = vpop.f32.mrf.mxu0  ;;  %1925 = vmatmul.mubr.bf16.vlgmr.msra.gmra.mxu1 %v994_v61  ;;  %v2093_v0 = vpop.eup %2092 }
 0x2ad   : > { %v947_v63 = vadd.f32 %v2291_v24, %v946_v62  ;;  %1973 = vmatpush3.bf16.msra.mxu1 %v2222_v7 }
 0x2ae   : > { %v1907_v1 = vpop.f32.mrf.mxu0  ;;  %1974 = vmatprep.subr.bf16.mxu1 %v2227_v8  ;;  %v2095_v2 = vpop.eup %2094 }
 0x2af   : > { %v958_v4 = vadd.f32 %v1907_v1, %v2291_v24  ;;  %2108 = vtanh.f32 %v947_v63 }
 0x2b0   : > { %v2097_v6 = vpop.eup %2096  ;;  %v949_v10 = vpop.f32.mrf.mxu0 }
 0x2b1   : > { %v2099_v12 = vpop.eup %2098  ;;  %v950_v14 = vadd.f32 %v2291_v24, %v949_v10  ;;  %v995_v15 = vpack.c.bf16 %v2097_v6, %v2093_v0  ;;  %1975 = vmatpush3.bf16.msra.mxu1 %v2227_v8  ;;  %2110 = vtanh.f32 %v958_v4 }
 0x2b2   : > { %v996_v7 = vpack.c.bf16 %v2095_v2, %v2099_v12  ;;  %1976 = vmatprep.subr.bf16.mxu1 %v2249_v18 }
 0x2b3   : > { %2112 = vtanh.f32 %v950_v14  ;;  %1928 = vmatprep.mubr.bf16.mxu1 %v995_v15 }
 0x2b4   : > { %2114 = vtanh.f32 %v955_v9  ;;  %1929 = vmatmul.mubr.bf16.gmra.mxu1 %v996_v7  ;;  %v2101_v16 = vpop.eup %2100 }
 0x2b5   : > { %1977 = vmatpush3.bf16.msra.mxu1 %v2249_v18 }
 0x2b6   : > { %1978 = vmatprep.subr.bf16.mxu1 %v2256_v19  ;;  %v2103_v26 = vpop.eup %2102 }
 0x2b8   : > { %v2105_v27 = vpop.eup %2104 }
 0x2b9   : > { %v2107_v28 = vpop.eup %2106  ;;  %v997_v24 = vpack.c.bf16 %v2105_v27, %v2101_v16  ;;  %1979 = vmatpush3.bf16.msra.mxu1 %v2256_v19  ;;  %v1958_v19 = vpop.f32.mrf.mxu0 }
 0x2ba   : > { %v998_v8 = vpack.c.bf16 %v2103_v26, %v2107_v28  ;;  %1980 = vmatprep.subr.bf16.mxu1 %v2263_v20 }
 0x2bb   : > { %1932 = vmatprep.mubr.bf16.mxu1 %v997_v24 }
 0x2bc   : > { %1933 = vmatmul.mubr.bf16.gmra.mxu1 %v998_v8  ;;  %v2109_v30 = vpop.eup %2108 }
 0x2bd   : > { %1981 = vmatpush3.bf16.msra.mxu1 %v2263_v20  ;;  %v1244_v20 = vpop.f32.mrf.mxu0 }
 0x2be   : > { %1982 = vmatprep.subr.bf16.mxu1 %v2270_v21  ;;  %v2111_v18 = vpop.eup %2110 }
 0x2bf   : > { %v1959_v11 = vpop.f32.mrf.mxu0 }
 0x2c0   : > { %v2113_v53 = vpop.eup %2112 }
 0x2c1   : > { %v2115_v56 = vpop.eup %2114  ;;  %v999_v3 = vpack.c.bf16 %v2113_v53, %v2109_v30  ;;  %1983 = vmatpush3.bf16.msra.mxu1 %v2270_v21  ;;  %v1247_v13 = vpop.f32.mrf.mxu0 }
 0x2c2   : > { %v1000_v5 = vpack.c.bf16 %v2111_v18, %v2115_v56  ;;  %1984 = vmatprep.subr.bf16.mxu1 %v2277_v22 }
 0x2c3   : > { %1936 = vmatprep.mubr.bf16.mxu1 %v999_v3  ;;  %v1962_v17 = vpop.f32.mrf.mxu0 }
 0x2c4   : > { %1937 = vmatmul.mubr.bf16.gmra.mxu1 %v1000_v5 }
 0x2c5   : > { %1985 = vmatpush3.bf16.msra.mxu1 %v2277_v22  ;;  %v1260_v25 = vpop.f32.mrf.mxu0 }
 0x2c6   : > { %1986 = vmatprep.subr.bf16.mxu1 %v2284_v23 }
 0x2c7   : > { %v1963_v31 = vpop.f32.mrf.mxu0 }
 0x2c9   : > { %1987 = vmatpush3.bf16.msra.mxu1 %v2284_v23  ;;  %v1263_v21 = vpop.f32.mrf.mxu0 }
 0x2cb   : > { %v1966_v22 = vpop.f32.mrf.mxu0 }
 0x2cd   : > { %v1276_v40 = vpop.f32.mrf.mxu0 }
 0x2cf   : > { %v1967_v47 = vpop.f32.mrf.mxu0 }
 0x2d1   : > { %v1279_v58 = vpop.f32.mrf.mxu0 }
 0x2d3   : > { %v1970_v1 = vpop.f32.mrf.mxu0 }
 0x2d5   : > { %v1292_v7 = vpop.f32.mrf.mxu0 }
 0x2d7   : > { %v1971_v30 = vpop.f32.mrf.mxu0 }
 0x36c   : > { %v1926_v33 = vpop.f32.mrf.mxu1 }
 0x36d   : > { %v1253_v34 = vadd.f32 %v1958_v19, %v1926_v33 }
 0x36e   : > { %v1099_v23 = vpop.f32.mrf.mxu1 }
 0x36f   : > { %v1315_v35 = vadd.f32 %v2492_v32, %v1253_v34  ;;  %v1245_v36 = vadd.f32 %v1244_v20, %v1099_v23 }
 0x370   : > { %v1927_v37 = vpop.f32.mrf.mxu1 }
 0x371   : > { %1484 = vst [vmem:[%s2498_s15 + $0x10] sm:$0xff] %v1315_v35  ;;  %v1313_v38 = vadd.f32 %v2492_v32, %v1245_v36  ;;  %v1256_v39 = vadd.f32 %v1959_v11, %v1927_v37 }
 0x372   : > { %v1102_v41 = vpop.f32.mrf.mxu1 }
 0x373   : > { %1482 = vst [vmem:[%s2498_s15] sm:$0xff] %v1313_v38  ;;  %v1316_v42 = vadd.f32 %v2492_v32, %v1256_v39  ;;  %v1248_v43 = vadd.f32 %v1247_v13, %v1102_v41  ;;  %v1295_v13 = vpop.f32.mrf.mxu0 }
 0x374   : > { %v1930_v44 = vpop.f32.mrf.mxu1 }
 0x375   : > { %1485 = vst [vmem:[%s2498_s15 + $0x18] sm:$0xff] %v1316_v42  ;;  %v1314_v45 = vadd.f32 %v2492_v32, %v1248_v43  ;;  %v1269_v46 = vadd.f32 %v1962_v17, %v1930_v44  ;;  %v1330_v52 = vpack.c.bf16 %v1316_v42, %v1315_v35 }
 0x376   : > { %v1115_v48 = vpop.f32.mrf.mxu1 }
 0x377   : > { %1483 = vst [vmem:[%s2498_s15 + $0x8] sm:$0xff] %v1314_v45  ;;  %v1319_v49 = vadd.f32 %v2492_v32, %v1269_v46  ;;  %v1261_v50 = vadd.f32 %v1260_v25, %v1115_v48  ;;  %v1329_v51 = vpack.c.bf16 %v1314_v45, %v1313_v38 }
 0x378   : > { %v1931_v54 = vpop.f32.mrf.mxu1 }
 0x379   : > { %1488 = vst [vmem:[%s2498_s15 + $0x30] sm:$0xff] %v1319_v49  ;;  %v1317_v55 = vadd.f32 %v2492_v32, %v1261_v50  ;;  %v1272_v57 = vadd.f32 %v1963_v31, %v1931_v54  ;;  %1988 = vmatprep.mubr.bf16.mxu1 %v1329_v51 }
 0x37a   : > { %v1118_v59 = vpop.f32.mrf.mxu1  ;;  %1989 = vmatmul.mubr.bf16.vlgmr.msra.gmra.mxu1 %v1330_v52 }
 0x37b   : > { %1486 = vst [vmem:[%s2498_s15 + $0x20] sm:$0xff] %v1317_v55  ;;  %v1320_v60 = vadd.f32 %v2492_v32, %v1272_v57  ;;  %v1264_v61 = vadd.f32 %v1263_v21, %v1118_v59 }
 0x37c   : > { %v1934_v62 = vpop.f32.mrf.mxu1 }
 0x37d   : > { %1489 = vst [vmem:[%s2498_s15 + $0x38] sm:$0xff] %v1320_v60  ;;  %v1318_v63 = vadd.f32 %v2492_v32, %v1264_v61  ;;  %v1285_v0 = vadd.f32 %v1966_v22, %v1934_v62  ;;  %v1332_v12 = vpack.c.bf16 %v1320_v60, %v1319_v49 }
 0x37e   : > { %v1131_v2 = vpop.f32.mrf.mxu1 }
 0x37f   : > { %1487 = vst [vmem:[%s2498_s15 + $0x28] sm:$0xff] %v1318_v63  ;;  %v1323_v4 = vadd.f32 %v2492_v32, %v1285_v0  ;;  %v1277_v6 = vadd.f32 %v1276_v40, %v1131_v2  ;;  %v1331_v9 = vpack.c.bf16 %v1318_v63, %v1317_v55 }
 0x380   : > { %v1935_v10 = vpop.f32.mrf.mxu1 }
 0x381   : > { %1492 = vst [vmem:[%s2498_s15 + $0x50] sm:$0xff] %v1323_v4  ;;  %v1321_v14 = vadd.f32 %v2492_v32, %v1277_v6  ;;  %v1288_v15 = vadd.f32 %v1967_v47, %v1935_v10  ;;  %1992 = vmatprep.mubr.bf16.mxu1 %v1331_v9 }
 0x382   : > { %v1134_v16 = vpop.f32.mrf.mxu1  ;;  %1993 = vmatmul.mubr.bf16.gmra.mxu1 %v1332_v12 }
 0x383   : > { %1490 = vst [vmem:[%s2498_s15 + $0x40] sm:$0xff] %v1321_v14  ;;  %v1324_v26 = vadd.f32 %v2492_v32, %v1288_v15  ;;  %v1280_v27 = vadd.f32 %v1279_v58, %v1134_v16 }
 0x384   : > { %v1938_v28 = vpop.f32.mrf.mxu1 }
 0x385   : > { %1493 = vst [vmem:[%s2498_s15 + $0x58] sm:$0xff] %v1324_v26  ;;  %v1322_v24 = vadd.f32 %v2492_v32, %v1280_v27  ;;  %v1301_v8 = vadd.f32 %v1970_v1, %v1938_v28  ;;  %v1334_v19 = vpack.c.bf16 %v1324_v26, %v1323_v4 }
 0x386   : > { %v1147_v18 = vpop.f32.mrf.mxu1 }
 0x387   : > { %1491 = vst [vmem:[%s2498_s15 + $0x48] sm:$0xff] %v1322_v24  ;;  %v1327_v53 = vadd.f32 %v2492_v32, %v1301_v8  ;;  %v1293_v56 = vadd.f32 %v1292_v7, %v1147_v18  ;;  %v1333_v3 = vpack.c.bf16 %v1322_v24, %v1321_v14 }
 0x388   : > { %v1939_v5 = vpop.f32.mrf.mxu1 }
 0x389   : > { %1496 = vst [vmem:[%s2498_s15 + $0x70] sm:$0xff] %v1327_v53  ;;  %v1325_v20 = vadd.f32 %v2492_v32, %v1293_v56  ;;  %v1304_v11 = vadd.f32 %v1971_v30, %v1939_v5  ;;  %1996 = vmatprep.mubr.bf16.mxu1 %v1333_v3 }
 0x38a   : > { %v1150_v17 = vpop.f32.mrf.mxu1  ;;  %1997 = vmatmul.mubr.bf16.gmra.mxu1 %v1334_v19 }
 0x38b   : > { %1494 = vst [vmem:[%s2498_s15 + $0x60] sm:$0xff] %v1325_v20  ;;  %v1328_v25 = vadd.f32 %v2492_v32, %v1304_v11  ;;  %v1296_v31 = vadd.f32 %v1295_v13, %v1150_v17 }
 0x38d   : > { %1497 = vst [vmem:[%s2498_s15 + $0x78] sm:$0xff] %v1328_v25  ;;  %v1326_v21 = vadd.f32 %v2492_v32, %v1296_v31  ;;  %v1336_v34 = vpack.c.bf16 %v1328_v25, %v1327_v53 }
 0x38f   : > { %1495 = vst [vmem:[%s2498_s15 + $0x68] sm:$0xff] %v1326_v21  ;;  %v1335_v33 = vpack.c.bf16 %v1326_v21, %v1325_v20 }
 0x391   : > { %2000 = vmatprep.mubr.bf16.mxu1 %v1335_v33 }
 0x392   : > { %2001 = vmatmul.mubr.bf16.gmra.mxu1 %v1336_v34 }
 0x43a   : > { %v1990_v22 = vpop.f32.mrf.mxu1 }
 0x43b   : > { %v1380_v23 = vadd.f32 %v1990_v22, %v2370_v29 }
 0x43c   : > { %v1371_v35 = vpop.f32.mrf.mxu1 }
 0x43d   : > { %1452 = vst [vmem:[%s2536_s19 + $0x10] sm:$0xff] %v1380_v23  ;;  %v1372_v32 = vadd.f32 %v2370_v29, %v1371_v35 }
 0x43e   : > { %v1991_v36 = vpop.f32.mrf.mxu1 }
 0x43f   : > { %1450 = vst [vmem:[%s2536_s19] sm:$0xff] %v1372_v32  ;;  %v1383_v37 = vadd.f32 %v1991_v36, %v2370_v29 }
 0x440   : > { %v1374_v38 = vpop.f32.mrf.mxu1 }
 0x441   : > { %1453 = vst [vmem:[%s2536_s19 + $0x18] sm:$0xff] %v1383_v37  ;;  %v1375_v39 = vadd.f32 %v2370_v29, %v1374_v38 }
 0x442   : > { %v1994_v40 = vpop.f32.mrf.mxu1 }
 0x443   : > { %1451 = vst [vmem:[%s2536_s19 + $0x8] sm:$0xff] %v1375_v39  ;;  %v1396_v41 = vadd.f32 %v1994_v40, %v2370_v29 }
 0x444   : > { %v1387_v42 = vpop.f32.mrf.mxu1 }
 0x445   : > { %1456 = vst [vmem:[%s2536_s19 + $0x30] sm:$0xff] %v1396_v41  ;;  %v1388_v43 = vadd.f32 %v2370_v29, %v1387_v42 }
 0x446   : > { %v1995_v44 = vpop.f32.mrf.mxu1 }
 0x447   : > { %1454 = vst [vmem:[%s2536_s19 + $0x20] sm:$0xff] %v1388_v43  ;;  %v1399_v45 = vadd.f32 %v1995_v44, %v2370_v29 }
 0x448   : > { %v1390_v46 = vpop.f32.mrf.mxu1 }
 0x449   : > { %1457 = vst [vmem:[%s2536_s19 + $0x38] sm:$0xff] %v1399_v45  ;;  %v1391_v47 = vadd.f32 %v2370_v29, %v1390_v46 }
 0x44a   : > { %v1998_v48 = vpop.f32.mrf.mxu1 }
 0x44b   : > { %1455 = vst [vmem:[%s2536_s19 + $0x28] sm:$0xff] %v1391_v47  ;;  %v1412_v49 = vadd.f32 %v1998_v48, %v2370_v29 }
 0x44c   : > { %v1403_v50 = vpop.f32.mrf.mxu1 }
 0x44d   : > { %1460 = vst [vmem:[%s2536_s19 + $0x50] sm:$0xff] %v1412_v49  ;;  %v1404_v51 = vadd.f32 %v2370_v29, %v1403_v50 }
 0x44e   : > { %v1999_v52 = vpop.f32.mrf.mxu1 }
 0x44f   : > { %1458 = vst [vmem:[%s2536_s19 + $0x40] sm:$0xff] %v1404_v51  ;;  %v1415_v54 = vadd.f32 %v1999_v52, %v2370_v29 }
 0x450   : > { %v1406_v55 = vpop.f32.mrf.mxu1 }
 0x451   : > { %1461 = vst [vmem:[%s2536_s19 + $0x58] sm:$0xff] %v1415_v54  ;;  %v1407_v57 = vadd.f32 %v2370_v29, %v1406_v55 }
 0x452   : > { %v2002_v58 = vpop.f32.mrf.mxu1 }
 0x453   : > { %1459 = vst [vmem:[%s2536_s19 + $0x48] sm:$0xff] %v1407_v57  ;;  %v1428_v59 = vadd.f32 %v2002_v58, %v2370_v29 }
 0x454   : > { %v1419_v60 = vpop.f32.mrf.mxu1 }
 0x455   : > { %1464 = vst [vmem:[%s2536_s19 + $0x70] sm:$0xff] %v1428_v59  ;;  %v1420_v61 = vadd.f32 %v2370_v29, %v1419_v60 }
 0x456   : > { %v2003_v62 = vpop.f32.mrf.mxu1 }
 0x457   : > { %1462 = vst [vmem:[%s2536_s19 + $0x60] sm:$0xff] %v1420_v61  ;;  %v1431_v63 = vadd.f32 %v2003_v62, %v2370_v29 }
 0x458   : > { %v1422_v0 = vpop.f32.mrf.mxu1 }
 0x459   : > { %1465 = vst [vmem:[%s2536_s19 + $0x78] sm:$0xff] %v1431_v63  ;;  %v1423_v1 = vadd.f32 %v2370_v29, %v1422_v0 }
 0x45b   : > { %1463 = vst [vmem:[%s2536_s19 + $0x68] sm:$0xff] %v1423_v1 }
 0x45c PF: > { %s22_s17 = sadd.s32 1, %s2122_s17  }
 0x45d   : > { %p19_p4 = scmp.ge.s32.totalorder %s22_s17, 4  }
 0x45f   :  { %21 = sbr.rel (!%p19_p4) target bundleno = 1 (0x1), region = 118 }

</bundles_post_ra>
